<compile_context>
chip_gen: v7x
topology: tpu7x:2x2x1
jax: 0.10.0
libtpu: 0.0.40
codegen_flags: <defaults>
</compile_context>

<pallas_src>
import functools

import jax
import jax.numpy as jnp
from jax import lax
from jax.experimental import pallas as pl
from jax.experimental.pallas import tpu as pltpu


def _spatial_decoder_kernel(
    x_ref,      # (1, d_xp, Np)        compute dtype, channel-major, node-padded
    h_ref,      # (1, d_model, Np)     float32 (exact pass-through into `out`)
    adj_ref,    # (S, TN, Np)          compute dtype, rows = output-node tile
    wgx_ref,    # (S*d_model, d_xp)    graph-conv weight, x-part, support-major rows
    wgh_ref,    # (S*d_model, d_model) graph-conv weight, h-part
    bm_ref,     # (d_model, 1)         f32
    wlg_ref,    # (d_model, d_model)   lin_out weight acting on gc
    wlh_ref,    # (d_model, d_model)   lin_out weight acting on h
    bl_ref,     # (d_model, 1)         f32
    wra_ref,    # (d_out, d_model)     read_out weight acting on act
    wrh_ref,    # (d_out, d_model)     read_out weight acting on h
    br_ref,     # (d_out, 1)           f32
    alpha_ref,  # (1,)  SMEM           PReLU slope
    read_ref,   # (1, d_out, TN)
    out_ref,    # (1, 2*d_model, TN)
):
    n_supports, tile_n, _ = adj_ref.shape
    d_model = wlg_ref.shape[0]
    cdt = x_ref.dtype

    # lane offset of this output-node tile inside the full (padded) node axis
    col = pl.multiple_of(pl.program_id(0) * tile_n, tile_n)

    x_all = x_ref[0]                              # (d_xp, Np)
    h_all = h_ref[0].astype(cdt)                  # (d_model, Np)

    # --- SpatialConvOrderK (order=1, include_self=False) ----------------------
    # project-then-propagate:  gc = b_mlp + sum_s (W_s @ [x;h]) @ A_s^T
    # rows of `pre` are support-major: [s*d_model : (s+1)*d_model] == W_s @ [x;h]
    pre = (jnp.dot(wgx_ref[...], x_all, preferred_element_type=jnp.float32)
           + jnp.dot(wgh_ref[...], h_all, preferred_element_type=jnp.float32)
           ).astype(cdt)                          # (S*d_model, Np)

    acc = jnp.zeros((d_model, tile_n), jnp.float32)
    for s in range(n_supports):
        pre_s = pre[s * d_model:(s + 1) * d_model]          # (d_model, Np)
        # contract over input nodes v:  out[c, w] = sum_v pre_s[c, v] * adj[s, w, v]
        acc = acc + lax.dot_general(
            pre_s, adj_ref[s],
            dimension_numbers=(((1,), (1,)), ((), ())),
            preferred_element_type=jnp.float32)
    gc = acc + bm_ref[...]                                  # (d_model, TN) f32

    # h restricted to this output-node tile (exact f32 for the pass-through)
    h_tile_f32 = h_ref[0, :, pl.ds(col, tile_n)]            # (d_model, TN)
    h_tile = h_tile_f32.astype(cdt)

    # --- lin_out (Conv1d 1x1 on cat([gc, h])) + PReLU --------------------------
    lin = (jnp.dot(wlg_ref[...], gc.astype(cdt), preferred_element_type=jnp.float32)
           + jnp.dot(wlh_ref[...], h_tile, preferred_element_type=jnp.float32)
           + bl_ref[...])
    alpha = alpha_ref[0]
    act = jnp.where(lin >= 0, lin, alpha * lin)             # (d_model, TN) f32

    # --- read_out (Conv1d 1x1 on cat([act, h])) --------------------------------
    ro = (jnp.dot(wra_ref[...], act.astype(cdt), preferred_element_type=jnp.float32)
          + jnp.dot(wrh_ref[...], h_tile, preferred_element_type=jnp.float32)
          + br_ref[...])                                    # (d_out, TN) f32

    read_ref[0] = ro.astype(read_ref.dtype)
    # `out` = cat([act, h]) written as two disjoint sublane slices (no concat).
    out_ref[0, :d_model, :] = act.astype(out_ref.dtype)
    out_ref[0, d_model:, :] = h_tile_f32.astype(out_ref.dtype)


def _round_up(v, m):
    return -(-v // m) * m


def _vmem_estimate_bytes(S, tn, n_pad, d_xp, d_model, d_out, cbytes):
    """Rough resident-VMEM estimate (double-buffered pipeline blocks + temporaries)."""
    adj_b = 2 * S * tn * n_pad * cbytes
    x_b = 2 * d_xp * n_pad * cbytes
    h_b = 2 * d_model * n_pad * 4
    out_b = 2 * (d_out + 2 * d_model) * tn * 4
    w_b = 2 * (S * d_model * (d_xp + d_model)
               + 2 * d_model * d_model + 2 * d_out * d_model) * cbytes
    tmp_b = (S * d_model + d_model + d_xp) * n_pad * 4 + 6 * d_model * tn * 4
    return adj_b + x_b + h_b + out_b + w_b + tmp_b


@functools.partial(jax.jit, static_argnames=("compute_dtype",))
def spatial_decoder_forward(x, h, adj, params, *, compute_dtype=jnp.bfloat16):
    """x: (b, d_x, n), h: (b, d_model, n), adj: (S, n, n)  -- PyTorch layout.

    Returns (read_out, out) = ((b, d_out, n), (b, 2*d_model, n)) in f32.
    `compute_dtype` is the MXU operand dtype (f32 accumulation always).
    """
    b, d_x, n = x.shape
    d_model = h.shape[1]
    S = adj.shape[0]
    d_out = params["w_read"].shape[0]
    d_in = d_x + d_model
    cbytes = jnp.dtype(compute_dtype).itemsize

    # ---- node (lane) padding & output-node tile selection ----------------------
    n_pad = _round_up(n, 128)          # lane-dense stores / matmuls need >=128 lanes
    d_xp = _round_up(d_x, 8)           # sublane-align the tiny x channel dim
    tn = 128
    for cand in (512, 256, 128):       # biggest tile that fits a conservative budget
        if n_pad % cand == 0 and _vmem_estimate_bytes(
                S, cand, n_pad, d_xp, d_model, d_out, cbytes) <= 40 * 2**20:
            tn = cand
            break
    n_tiles = n_pad // tn
    vmem_limit = int(min(max(_vmem_estimate_bytes(
        S, tn, n_pad, d_xp, d_model, d_out, cbytes) + 8 * 2**20,
        32 * 2**20), 48 * 2**20))      # <=48 MiB so it also fits v7x's 64 MiB VMEM

    # ---- pad nodes (zeros are exactly neutral for every matmul) ----------------
    x_p = jnp.pad(x, ((0, 0), (0, d_xp - d_x), (0, n_pad - n))).astype(compute_dtype)
    h_p = jnp.pad(h, ((0, 0), (0, 0), (0, n_pad - n))).astype(jnp.float32)
    adj_p = jnp.pad(adj, ((0, 0), (0, n_pad - n), (0, n_pad - n))).astype(compute_dtype)

    # ---- split the 1x1-conv weights per concat segment (no in-kernel concats) --
    w_mlp = params["w_mlp"].reshape(d_model, S, d_in)        # c_in = [support][x | h]
    wgx = w_mlp[:, :, :d_x].transpose(1, 0, 2).reshape(S * d_model, d_x)
    wgx = jnp.pad(wgx, ((0, 0), (0, d_xp - d_x))).astype(compute_dtype)
    wgh = w_mlp[:, :, d_x:].transpose(1, 0, 2).reshape(S * d_model, d_model)
    wgh = wgh.astype(compute_dtype)
    wlg = params["w_lin"][:, :d_model].astype(compute_dtype)
    wlh = params["w_lin"][:, d_model:].astype(compute_dtype)
    wra = params["w_read"][:, :d_model].astype(compute_dtype)
    wrh = params["w_read"][:, d_model:].astype(compute_dtype)
    bm = params["b_mlp"].reshape(d_model, 1).astype(jnp.float32)
    bl = params["b_lin"].reshape(d_model, 1).astype(jnp.float32)
    br = params["b_read"].reshape(d_out, 1).astype(jnp.float32)
    alpha = params["prelu_a"].reshape(1).astype(jnp.float32)

    # Batch is the innermost grid axis so each adjacency row-tile (index only
    # depends on j) is DMA'd once and reused for every batch element.
    # NOTE: constant-index weight specs could additionally use
    # pipeline_mode=pl.Buffered(1) to shave a few KiB of VMEM; skipped (negligible).
    read_p, out_p = pl.pallas_call(
        _spatial_decoder_kernel,
        out_shape=(
            jax.ShapeDtypeStruct((b, d_out, n_pad), jnp.float32),
            jax.ShapeDtypeStruct((b, 2 * d_model, n_pad), jnp.float32),
        ),
        grid=(n_tiles, b),
        in_specs=[
            pl.BlockSpec((1, d_xp, n_pad), lambda j, i: (i, 0, 0)),
            pl.BlockSpec((1, d_model, n_pad), lambda j, i: (i, 0, 0)),
            pl.BlockSpec((S, tn, n_pad), lambda j, i: (0, j, 0)),
            pl.BlockSpec((S * d_model, d_xp), lambda j, i: (0, 0)),
            pl.BlockSpec((S * d_model, d_model), lambda j, i: (0, 0)),
            pl.BlockSpec((d_model, 1), lambda j, i: (0, 0)),
            pl.BlockSpec((d_model, d_model), lambda j, i: (0, 0)),
            pl.BlockSpec((d_model, d_model), lambda j, i: (0, 0)),
            pl.BlockSpec((d_model, 1), lambda j, i: (0, 0)),
            pl.BlockSpec((d_out, d_model), lambda j, i: (0, 0)),
            pl.BlockSpec((d_out, d_model), lambda j, i: (0, 0)),
            pl.BlockSpec((d_out, 1), lambda j, i: (0, 0)),
            pl.BlockSpec(memory_space=pltpu.MemorySpace.SMEM),
        ],
        out_specs=(
            pl.BlockSpec((1, d_out, tn), lambda j, i: (i, 0, j)),
            pl.BlockSpec((1, 2 * d_model, tn), lambda j, i: (i, 0, j)),
        ),
        compiler_params=pltpu.CompilerParams(
            dimension_semantics=("parallel", "parallel"),
            vmem_limit_bytes=vmem_limit,
        ),
    )(x_p, h_p, adj_p, wgx, wgh, bm, wlg, wlh, bl, wra, wrh, br, alpha)

    if n_pad != n:
        read_p = read_p[:, :, :n]
        out_p = out_p[:, :, :n]
    return read_p, out_p


def _reference(x, h, adj, params):
    """Pure-JAX mirror of the PyTorch forward (channel-major layout)."""
    xin = jnp.concatenate([x, h], axis=1)                            # (b, d_in, n)
    props = [jnp.einsum("bcv,wv->bcw", xin, adj[s]) for s in range(adj.shape[0])]
    stacked = jnp.concatenate(props, axis=1)                         # (b, S*d_in, n)
    gc = jnp.einsum("bcn,mc->bmn", stacked, params["w_mlp"]) + params["b_mlp"][None, :, None]
    cat1 = jnp.concatenate([gc, h], axis=1)
    lin = jnp.einsum("bcn,mc->bmn", cat1, params["w_lin"]) + params["b_lin"][None, :, None]
    a = params["prelu_a"]
    act = jnp.where(lin >= 0, lin, a * lin)
    cat2 = jnp.concatenate([act, h], axis=1)
    ro = jnp.einsum("bcn,mc->bmn", cat2, params["w_read"]) + params["b_read"][None, :, None]
    return ro, cat2


if __name__ == "__main__":
    # small shapes consistent with the module (order=1, attention_block=False)
    b, n = 2, 16           # batch, num graph nodes
    d_x, d_model = 4, 32   # input feature channels of x; hidden size
    d_in = d_x + d_model   # channels of cat([x, h], 1) -> graph_conv c_in
    d_out = 8
    support_len = 2        # e.g. forward / backward diffusion matrices

    key = jax.random.PRNGKey(0)
    ks = jax.random.split(key, 10)

    x = jax.random.normal(ks[0], (b, d_x, n), dtype=jnp.float32)
    h = jax.random.normal(ks[1], (b, d_model, n), dtype=jnp.float32)
    raw = jax.random.uniform(ks[2], (support_len, n, n), dtype=jnp.float32)
    adj = raw / (raw.sum(axis=-1, keepdims=True) + 1e-6)

    params = {
        # graph_conv.mlp: Conv2d(support_len*d_in, d_model, 1x1)
        "w_mlp": 0.1 * jax.random.normal(ks[3], (d_model, support_len * d_in), dtype=jnp.float32),
        "b_mlp": 0.1 * jax.random.normal(ks[4], (d_model,), dtype=jnp.float32),
        # lin_out: Conv1d(2*d_model, d_model, 1)
        "w_lin": 0.1 * jax.random.normal(ks[5], (d_model, 2 * d_model), dtype=jnp.float32),
        "b_lin": 0.1 * jax.random.normal(ks[6], (d_model,), dtype=jnp.float32),
        # read_out: Conv1d(2*d_model, d_out, 1)
        "w_read": 0.1 * jax.random.normal(ks[7], (d_out, 2 * d_model), dtype=jnp.float32),
        "b_read": 0.1 * jax.random.normal(ks[8], (d_out,), dtype=jnp.float32),
        # nn.PReLU() default single slope = 0.25
        "prelu_a": jnp.asarray(0.25, dtype=jnp.float32),
    }

    ref_read, ref_out = _reference(x, h, adj, params)

    # 1) exact-math check: f32 operands through the same kernel
    r32, o32 = spatial_decoder_forward(x, h, adj, params, compute_dtype=jnp.float32)
    jax.block_until_ready((r32, o32))
    assert r32.shape == (b, d_out, n) and o32.shape == (b, 2 * d_model, n)
    assert jnp.allclose(r32, ref_read, rtol=1e-3, atol=1e-3)
    assert jnp.allclose(o32, ref_out, rtol=1e-3, atol=1e-3)

    # 2) production path: bf16 operands (halved HBM traffic), f32 accumulation
    rbf, obf = spatial_decoder_forward(x, h, adj, params)
    jax.block_until_ready((rbf, obf))
    assert rbf.shape == (b, d_out, n) and obf.shape == (b, 2 * d_model, n)
    assert jnp.allclose(rbf, ref_read, rtol=6e-2, atol=6e-2)
    assert jnp.allclose(obf, ref_out, rtol=6e-2, atol=6e-2)

    print("KERNEL_OK")
</pallas_src>

<mosaic_0001>
module attributes {stable_mosaic.version = 11 : i64} {
  func.func @_spatial_decoder_kernel(%arg0: i32, %arg1: i32, %arg2: memref<1x8x128xf32, #tpu.memory_space<vmem>>, %arg3: memref<1x32x128xf32, #tpu.memory_space<vmem>>, %arg4: memref<2x128x128xf32, #tpu.memory_space<vmem>>, %arg5: memref<64x8xf32, #tpu.memory_space<vmem>>, %arg6: memref<64x32xf32, #tpu.memory_space<vmem>>, %arg7: memref<32x1xf32, #tpu.memory_space<vmem>>, %arg8: memref<32x32xf32, #tpu.memory_space<vmem>>, %arg9: memref<32x32xf32, #tpu.memory_space<vmem>>, %arg10: memref<32x1xf32, #tpu.memory_space<vmem>>, %arg11: memref<8x32xf32, #tpu.memory_space<vmem>>, %arg12: memref<8x32xf32, #tpu.memory_space<vmem>>, %arg13: memref<8x1xf32, #tpu.memory_space<vmem>>, %arg14: memref<1xf32, #tpu.memory_space<smem>>, %arg15: memref<1x8x128xf32, #tpu.memory_space<vmem>>, %arg16: memref<1x64x128xf32, #tpu.memory_space<vmem>>) attributes {dimension_semantics = [#tpu.dimension_semantics<parallel>, #tpu.dimension_semantics<parallel>], iteration_bounds = array<i64: 1, 2>, scalar_prefetch = 0 : i64, scratch_operands = 0 : i64, tpu.core_type = #tpu.core_type<tc>, window_params = [{transform_indices = @transform_0, window_bounds = array<i64: 1, 8, 128>}, {transform_indices = @transform_1, window_bounds = array<i64: 1, 32, 128>}, {transform_indices = @transform_2, window_bounds = array<i64: 2, 128, 128>}, {pipeline_mode = #tpu.pipeline_mode<synchronous>, transform_indices = @transform_3, window_bounds = array<i64: 64, 8>}, {pipeline_mode = #tpu.pipeline_mode<synchronous>, transform_indices = @transform_4, window_bounds = array<i64: 64, 32>}, {pipeline_mode = #tpu.pipeline_mode<synchronous>, transform_indices = @transform_5, window_bounds = array<i64: 32, 1>}, {pipeline_mode = #tpu.pipeline_mode<synchronous>, transform_indices = @transform_6, window_bounds = array<i64: 32, 32>}, {pipeline_mode = #tpu.pipeline_mode<synchronous>, transform_indices = @transform_7, window_bounds = array<i64: 32, 32>}, {pipeline_mode = #tpu.pipeline_mode<synchronous>, transform_indices = @transform_8, window_bounds = array<i64: 32, 1>}, {pipeline_mode = #tpu.pipeline_mode<synchronous>, transform_indices = @transform_9, window_bounds = array<i64: 8, 32>}, {pipeline_mode = #tpu.pipeline_mode<synchronous>, transform_indices = @transform_10, window_bounds = array<i64: 8, 32>}, {pipeline_mode = #tpu.pipeline_mode<synchronous>, transform_indices = @transform_11, window_bounds = array<i64: 8, 1>}, {transform_indices = @transform_12, window_bounds = array<i64: 1>}, {transform_indices = @transform_13, window_bounds = array<i64: 1, 8, 128>}, {transform_indices = @transform_14, window_bounds = array<i64: 1, 64, 128>}]} {
    %c128_i32 = arith.constant 128 : i32
    %0 = arith.muli %arg0, %c128_i32 : i32
    %1 = tpu.assume_multiple %0, 128 : i32
    %c0 = arith.constant 0 : index
    %c0_0 = arith.constant 0 : index
    %c0_1 = arith.constant 0 : index
    %2 = vector.load %arg2[%c0, %c0_0, %c0_1] : memref<1x8x128xf32, #tpu.memory_space<vmem>>, vector<1x8x128xf32>
    %3 = vector.shape_cast %2 : vector<1x8x128xf32> to vector<8x128xf32>
    %c0_2 = arith.constant 0 : index
    %c0_3 = arith.constant 0 : index
    %c0_4 = arith.constant 0 : index
    %4 = vector.load %arg3[%c0_2, %c0_3, %c0_4] : memref<1x32x128xf32, #tpu.memory_space<vmem>>, vector<1x32x128xf32>
    %5 = vector.shape_cast %4 : vector<1x32x128xf32> to vector<32x128xf32>
    %c0_5 = arith.constant 0 : index
    %c0_6 = arith.constant 0 : index
    %6 = vector.load %arg5[%c0_5, %c0_6] : memref<64x8xf32, #tpu.memory_space<vmem>>, vector<64x8xf32>
    %cst = arith.constant dense<0.000000e+00> : vector<64x128xf32>
    %7 = tpu.matmul %6, %3, %cst {dimension_numbers = #tpu.dot_dimension_numbers<[1], [0], [0], [1], [0, 0, 1, 1], [], []>} : vector<64x8xf32>, vector<8x128xf32>, vector<64x128xf32> -> vector<64x128xf32>
    %c0_7 = arith.constant 0 : index
    %c0_8 = arith.constant 0 : index
    %8 = vector.load %arg6[%c0_7, %c0_8] : memref<64x32xf32, #tpu.memory_space<vmem>>, vector<64x32xf32>
    %cst_9 = arith.constant dense<0.000000e+00> : vector<64x128xf32>
    %9 = tpu.matmul %8, %5, %cst_9 {dimension_numbers = #tpu.dot_dimension_numbers<[1], [0], [0], [1], [0, 0, 1, 1], [], []>} : vector<64x32xf32>, vector<32x128xf32>, vector<64x128xf32> -> vector<64x128xf32>
    %10 = arith.addf %7, %9 : vector<64x128xf32>
    %cst_10 = arith.constant 0.000000e+00 : f32
    %11 = vector.broadcast %cst_10 : f32 to vector<32x128xf32>
    %12 = vector.extract_strided_slice %10 {offsets = [0, 0], sizes = [32, 128], strides = [1, 1]} : vector<64x128xf32> to vector<32x128xf32>
    %c0_11 = arith.constant 0 : index
    %c0_12 = arith.constant 0 : index
    %c0_13 = arith.constant 0 : index
    %13 = vector.load %arg4[%c0_11, %c0_12, %c0_13] : memref<2x128x128xf32, #tpu.memory_space<vmem>>, vector<1x128x128xf32>
    %14 = vector.shape_cast %13 : vector<1x128x128xf32> to vector<128x128xf32>
    %cst_14 = arith.constant dense<0.000000e+00> : vector<32x128xf32>
    %15 = tpu.matmul %12, %14, %cst_14 {dimension_numbers = #tpu.dot_dimension_numbers<[1], [1], [0], [0], [0, 0, 1, 0], [], []>} : vector<32x128xf32>, vector<128x128xf32>, vector<32x128xf32> -> vector<32x128xf32>
    %16 = arith.addf %11, %15 : vector<32x128xf32>
    %17 = vector.extract_strided_slice %10 {offsets = [32, 0], sizes = [32, 128], strides = [1, 1]} : vector<64x128xf32> to vector<32x128xf32>
    %c1 = arith.constant 1 : index
    %c0_15 = arith.constant 0 : index
    %c0_16 = arith.constant 0 : index
    %18 = vector.load %arg4[%c1, %c0_15, %c0_16] : memref<2x128x128xf32, #tpu.memory_space<vmem>>, vector<1x128x128xf32>
    %19 = vector.shape_cast %18 : vector<1x128x128xf32> to vector<128x128xf32>
    %cst_17 = arith.constant dense<0.000000e+00> : vector<32x128xf32>
    %20 = tpu.matmul %17, %19, %cst_17 {dimension_numbers = #tpu.dot_dimension_numbers<[1], [1], [0], [0], [0, 0, 1, 0], [], []>} : vector<32x128xf32>, vector<128x128xf32>, vector<32x128xf32> -> vector<32x128xf32>
    %21 = arith.addf %16, %20 : vector<32x128xf32>
    %c0_18 = arith.constant 0 : index
    %c0_19 = arith.constant 0 : index
    %22 = vector.load %arg7[%c0_18, %c0_19] : memref<32x1xf32, #tpu.memory_space<vmem>>, vector<32x1xf32>
    %23 = vector.broadcast %22 : vector<32x1xf32> to vector<32x128xf32>
    %24 = arith.addf %21, %23 : vector<32x128xf32>
    %c0_20 = arith.constant 0 : index
    %c0_21 = arith.constant 0 : index
    %25 = arith.index_cast %1 : i32 to index
    %26 = vector.load %arg3[%c0_20, %c0_21, %25] : memref<1x32x128xf32, #tpu.memory_space<vmem>>, vector<1x32x128xf32>
    %27 = vector.shape_cast %26 : vector<1x32x128xf32> to vector<32x128xf32>
    %c0_22 = arith.constant 0 : index
    %c0_23 = arith.constant 0 : index
    %28 = vector.load %arg8[%c0_22, %c0_23] : memref<32x32xf32, #tpu.memory_space<vmem>>, vector<32x32xf32>
    %cst_24 = arith.constant dense<0.000000e+00> : vector<32x128xf32>
    %29 = tpu.matmul %28, %24, %cst_24 {dimension_numbers = #tpu.dot_dimension_numbers<[1], [0], [0], [1], [0, 0, 1, 1], [], []>} : vector<32x32xf32>, vector<32x128xf32>, vector<32x128xf32> -> vector<32x128xf32>
    %c0_25 = arith.constant 0 : index
    %c0_26 = arith.constant 0 : index
    %30 = vector.load %arg9[%c0_25, %c0_26] : memref<32x32xf32, #tpu.memory_space<vmem>>, vector<32x32xf32>
    %cst_27 = arith.constant dense<0.000000e+00> : vector<32x128xf32>
    %31 = tpu.matmul %30, %27, %cst_27 {dimension_numbers = #tpu.dot_dimension_numbers<[1], [0], [0], [1], [0, 0, 1, 1], [], []>} : vector<32x32xf32>, vector<32x128xf32>, vector<32x128xf32> -> vector<32x128xf32>
    %32 = arith.addf %29, %31 : vector<32x128xf32>
    %c0_28 = arith.constant 0 : index
    %c0_29 = arith.constant 0 : index
    %33 = vector.load %arg10[%c0_28, %c0_29] : memref<32x1xf32, #tpu.memory_space<vmem>>, vector<32x1xf32>
    %34 = vector.broadcast %33 : vector<32x1xf32> to vector<32x128xf32>
    %35 = arith.addf %32, %34 : vector<32x128xf32>
    %c0_30 = arith.constant 0 : index
    %36 = memref.load %arg14[%c0_30] : memref<1xf32, #tpu.memory_space<smem>>
    %cst_31 = arith.constant 0.000000e+00 : f32
    %37 = vector.broadcast %cst_31 : f32 to vector<32x128xf32>
    %38 = arith.cmpf oge, %35, %37 : vector<32x128xf32>
    %39 = vector.broadcast %36 : f32 to vector<32x128xf32>
    %40 = arith.mulf %39, %35 : vector<32x128xf32>
    %41 = arith.select %38, %35, %40 : vector<32x128xi1>, vector<32x128xf32>
    %c0_32 = arith.constant 0 : index
    %c0_33 = arith.constant 0 : index
    %42 = vector.load %arg11[%c0_32, %c0_33] : memref<8x32xf32, #tpu.memory_space<vmem>>, vector<8x32xf32>
    %cst_34 = arith.constant dense<0.000000e+00> : vector<8x128xf32>
    %43 = tpu.matmul %42, %41, %cst_34 {dimension_numbers = #tpu.dot_dimension_numbers<[1], [0], [0], [1], [0, 0, 1, 1], [], []>} : vector<8x32xf32>, vector<32x128xf32>, vector<8x128xf32> -> vector<8x128xf32>
    %c0_35 = arith.constant 0 : index
    %c0_36 = arith.constant 0 : index
    %44 = vector.load %arg12[%c0_35, %c0_36] : memref<8x32xf32, #tpu.memory_space<vmem>>, vector<8x32xf32>
    %cst_37 = arith.constant dense<0.000000e+00> : vector<8x128xf32>
    %45 = tpu.matmul %44, %27, %cst_37 {dimension_numbers = #tpu.dot_dimension_numbers<[1], [0], [0], [1], [0, 0, 1, 1], [], []>} : vector<8x32xf32>, vector<32x128xf32>, vector<8x128xf32> -> vector<8x128xf32>
    %46 = arith.addf %43, %45 : vector<8x128xf32>
    %c0_38 = arith.constant 0 : index
    %c0_39 = arith.constant 0 : index
    %47 = vector.load %arg13[%c0_38, %c0_39] : memref<8x1xf32, #tpu.memory_space<vmem>>, vector<8x1xf32>
    %48 = vector.broadcast %47 : vector<8x1xf32> to vector<8x128xf32>
    %49 = arith.addf %46, %48 : vector<8x128xf32>
    %c0_40 = arith.constant 0 : index
    %c0_41 = arith.constant 0 : index
    %c0_42 = arith.constant 0 : index
    %50 = vector.load %arg15[%c0_40, %c0_41, %c0_42] : memref<1x8x128xf32, #tpu.memory_space<vmem>>, vector<1x8x128xf32>
    %51 = vector.shape_cast %50 : vector<1x8x128xf32> to vector<8x128xf32>
    %52 = vector.shape_cast %49 : vector<8x128xf32> to vector<1x8x128xf32>
    tpu.vector_store %arg15[%c0_40, %c0_41, %c0_42], %52 {strides = array<i32>} : memref<1x8x128xf32, #tpu.memory_space<vmem>>, vector<1x8x128xf32>,
    %c0_43 = arith.constant 0 : index
    %c0_44 = arith.constant 0 : index
    %c0_45 = arith.constant 0 : index
    %53 = vector.load %arg16[%c0_43, %c0_44, %c0_45] : memref<1x64x128xf32, #tpu.memory_space<vmem>>, vector<1x32x128xf32>
    %54 = vector.shape_cast %53 : vector<1x32x128xf32> to vector<32x128xf32>
    %55 = vector.shape_cast %41 : vector<32x128xf32> to vector<1x32x128xf32>
    tpu.vector_store %arg16[%c0_43, %c0_44, %c0_45], %55 {strides = array<i32>} : memref<1x64x128xf32, #tpu.memory_space<vmem>>, vector<1x32x128xf32>,
    %c0_46 = arith.constant 0 : index
    %c32 = arith.constant 32 : index
    %c0_47 = arith.constant 0 : index
    %56 = vector.load %arg16[%c0_46, %c32, %c0_47] : memref<1x64x128xf32, #tpu.memory_space<vmem>>, vector<1x32x128xf32>
    %57 = vector.shape_cast %56 : vector<1x32x128xf32> to vector<32x128xf32>
    %58 = vector.shape_cast %27 : vector<32x128xf32> to vector<1x32x128xf32>
    tpu.vector_store %arg16[%c0_46, %c32, %c0_47], %58 {strides = array<i32>} : memref<1x64x128xf32, #tpu.memory_space<vmem>>, vector<1x32x128xf32>,
    return
  }
  func.func @transform_0(%arg0: i32, %arg1: i32) -> (i32, i32, i32) {
    %c0_i32 = arith.constant 0 : i32
    %c0_i32_0 = arith.constant 0 : i32
    %c0_i32_1 = arith.constant 0 : i32
    return %arg1, %c0_i32, %c0_i32_0 : i32, i32, i32
  }
  func.func @transform_1(%arg0: i32, %arg1: i32) -> (i32, i32, i32) {
    %c0_i32 = arith.constant 0 : i32
    %c0_i32_0 = arith.constant 0 : i32
    %c0_i32_1 = arith.constant 0 : i32
    return %arg1, %c0_i32, %c0_i32_0 : i32, i32, i32
  }
  func.func @transform_2(%arg0: i32, %arg1: i32) -> (i32, i32, i32) {
    %c0_i32 = arith.constant 0 : i32
    %c0_i32_0 = arith.constant 0 : i32
    %c0_i32_1 = arith.constant 0 : i32
    return %c0_i32, %arg0, %c0_i32_0 : i32, i32, i32
  }
  func.func @transform_3(%arg0: i32, %arg1: i32) -> (i32, i32) {
    %c0_i32 = arith.constant 0 : i32
    %c0_i32_0 = arith.constant 0 : i32
    %c0_i32_1 = arith.constant 0 : i32
    return %c0_i32, %c0_i32_0 : i32, i32
  }
  func.func @transform_4(%arg0: i32, %arg1: i32) -> (i32, i32) {
    %c0_i32 = arith.constant 0 : i32
    %c0_i32_0 = arith.constant 0 : i32
    %c0_i32_1 = arith.constant 0 : i32
    return %c0_i32, %c0_i32_0 : i32, i32
  }
  func.func @transform_5(%arg0: i32, %arg1: i32) -> (i32, i32) {
    %c0_i32 = arith.constant 0 : i32
    %c0_i32_0 = arith.constant 0 : i32
    %c0_i32_1 = arith.constant 0 : i32
    return %c0_i32, %c0_i32_0 : i32, i32
  }
  func.func @transform_6(%arg0: i32, %arg1: i32) -> (i32, i32) {
    %c0_i32 = arith.constant 0 : i32
    %c0_i32_0 = arith.constant 0 : i32
    %c0_i32_1 = arith.constant 0 : i32
    return %c0_i32, %c0_i32_0 : i32, i32
  }
  func.func @transform_7(%arg0: i32, %arg1: i32) -> (i32, i32) {
    %c0_i32 = arith.constant 0 : i32
    %c0_i32_0 = arith.constant 0 : i32
    %c0_i32_1 = arith.constant 0 : i32
    return %c0_i32, %c0_i32_0 : i32, i32
  }
  func.func @transform_8(%arg0: i32, %arg1: i32) -> (i32, i32) {
    %c0_i32 = arith.constant 0 : i32
    %c0_i32_0 = arith.constant 0 : i32
    %c0_i32_1 = arith.constant 0 : i32
    return %c0_i32, %c0_i32_0 : i32, i32
  }
  func.func @transform_9(%arg0: i32, %arg1: i32) -> (i32, i32) {
    %c0_i32 = arith.constant 0 : i32
    %c0_i32_0 = arith.constant 0 : i32
    %c0_i32_1 = arith.constant 0 : i32
    return %c0_i32, %c0_i32_0 : i32, i32
  }
  func.func @transform_10(%arg0: i32, %arg1: i32) -> (i32, i32) {
    %c0_i32 = arith.constant 0 : i32
    %c0_i32_0 = arith.constant 0 : i32
    %c0_i32_1 = arith.constant 0 : i32
    return %c0_i32, %c0_i32_0 : i32, i32
  }
  func.func @transform_11(%arg0: i32, %arg1: i32) -> (i32, i32) {
    %c0_i32 = arith.constant 0 : i32
    %c0_i32_0 = arith.constant 0 : i32
    %c0_i32_1 = arith.constant 0 : i32
    return %c0_i32, %c0_i32_0 : i32, i32
  }
  func.func @transform_12(%arg0: i32, %arg1: i32) -> i32 {
    %c0_i32 = arith.constant 0 : i32
    %c0_i32_0 = arith.constant 0 : i32
    return %c0_i32 : i32
  }
  func.func @transform_13(%arg0: i32, %arg1: i32) -> (i32, i32, i32) {
    %c0_i32 = arith.constant 0 : i32
    %c0_i32_0 = arith.constant 0 : i32
    return %arg1, %c0_i32, %arg0 : i32, i32, i32
  }
  func.func @transform_14(%arg0: i32, %arg1: i32) -> (i32, i32, i32) {
    %c0_i32 = arith.constant 0 : i32
    %c0_i32_0 = arith.constant 0 : i32
    return %arg1, %c0_i32, %arg0 : i32, i32, i32
  }
}

</mosaic_0001>

<bundles_post_ra>
// kernel: spatial_decoder_forward.1
= control target key start
LH: loop header
LB: loop body
LE: loop exit
PB: predicated region body
PF: predicated region fallthrough
CT: control target
= control target key end

     0   :  { %s2664_s0 = inlined_call_operand.vmem [shape: f32[2,8,128], index: 0, kind: input, shape index: {}]   ;;  %s2665_s1 = inlined_call_operand.vmem [shape: f32[2,32,128], index: 1, kind: input, shape index: {}]   ;;  %s2666_s2 = inlined_call_operand.vmem [shape: f32[2,128,128], index: 2, kind: input, shape index: {}]   ;;  %s2667_s3 = inlined_call_operand.vmem [shape: f32[64,8], index: 3, kind: input, shape index: {}]   ;;  %s2668_s4 = inlined_call_operand.vmem [shape: f32[64,32], index: 4, kind: input, shape index: {}]   ;;  %s2669_s5 = inlined_call_operand.vmem [shape: f32[32,1], index: 5, kind: input, shape index: {}]   ;;  %s2670_s6 = inlined_call_operand.vmem [shape: f32[32,32], index: 6, kind: input, shape index: {}]   ;;  %s2671_s7 = inlined_call_operand.vmem [shape: f32[32,32], index: 7, kind: input, shape index: {}]   ;;  %s2672_s8 = inlined_call_operand.vmem [shape: f32[32,1], index: 8, kind: input, shape index: {}]   ;;  %s2673_s9 = inlined_call_operand.vmem [shape: f32[8,32], index: 9, kind: input, shape index: {}]   ;;  %s2674_s10 = inlined_call_operand.vmem [shape: f32[8,32], index: 10, kind: input, shape index: {}]   ;;  %s2675_s11 = inlined_call_operand.vmem [shape: f32[8,1], index: 11, kind: input, shape index: {}]   ;;  %s2676_s12 = inlined_call_operand.<no memory space> [shape: f32[1], index: 12, kind: input, shape index: {}]   ;;  %s2677_s13 = inlined_call_operand.hbm [shape: f32[2,8,128], index: 13, kind: output, shape index: {0}]   ;;  %s2678_s14 = inlined_call_operand.vmem [shape: f32[2,64,128], index: 14, kind: output, shape index: {1}]  }
   0x1   :  { %20 = sst [smem:[#allocation2]] %s2676_s12 }
   0x2   :  { %21 = vsyncpa [#allocation4], 0 }
   0x3   :  { %23 = vsyncpa [#allocation4 + $0x1], 0  ;;  %s2274_s15 = smov 0   ;;  %s2276_s16 = smov 0  }
   0x4   :  { %s2278_s17 = smov 0   ;;  %s2280_s18 = smov 0  }
   0x5   :  { %s2282_s19 = smov 0   ;;  %s2284_s20 = smov 0  }
   0x6 LB: > { %2684 = sst [smem:[#allocation6_spill]] %s2169_s15  ;;  %s1627_s12 = sadd.s32 4294967295, %s2189_s20   ;;  %s2189_s20 = sphi %s2284_s20, %s29_s20   ;;  %s2185_s19 = sphi %s2282_s19, %s2697_s19   ;;  %s2181_s18 = sphi %s2280_s18, %s2696_s18   ;;  %s2177_s17 = sphi %s2278_s17, %s2695_s17   ;;  %s2173_s16 = sphi %s2276_s16, %s2699_s16   ;;  %s2169_s15 = sphi %s2274_s15, %s2698_s15  }
   0x7   : > { %2685 = sst [smem:[#allocation7_spill]] %s2177_s17  ;;  %s1628_s21 = sadd.s32 4294967294, %s2189_s20  }
   0x8   : > { %2686 = sst [smem:[#allocation8_spill]] %s2185_s19  ;;  %s38_s22 = sadd.s32 1, %s2185_s19 }
   0x9   : > { %s338_s23 = sadd.s32 1, %s2177_s17  ;;  %p39_p0 = scmp.ge.s32.totalorder %s38_s22, 2 }
   0xa   : > { %p348_p1 = scmp.ne.s32.totalorder %s2177_s17, %s2173_s16  ;;  %p349_p2 = scmp.eq.s32.totalorder %s1627_s12, 1 }
   0xb   : > { %p354_p3 = scmp.ne.s32.totalorder %s2173_s16, %s2169_s15  ;;  %s2701_s22 = smov (%p39_p0, %s38_s22), 0 }
   0xc   : > { %2687 = sst [smem:[#allocation9_spill]] %s2701_s22  ;;  %p2314_p4 = por %p349_p2, %p348_p1 }
   0xd   : > { %p355_p5 = scmp.eq.s32.totalorder %s1628_s21, 1  ;;  %s333_s25 = ssub.s32 %s2185_s19, %s2701_s22 }
   0xe   : > { %p1632_p6 = scmp.ge.s32.totalorder %s2189_s20, 1  ;;  %p336_p7 = scmp.eq.s32.totalorder %s333_s25, 0 }
   0xf   : > { %p2321_p8 = por %p355_p5, %p354_p3  ;;  %p455_p9 = scmp.lt.s32.totalorder %s2189_s20, 3 }
  0x10   : > { %s2327_s27 = scalar_select %p336_p7, %s2177_s17, %s338_s23  }
  0x11   : > { %s2689_s26 = scalar_select %p2321_p8, 1, 0 }
  0x12   : > { %2691 = sst [smem:[#allocation11_spill]] %s2327_s27  ;;  %p456_p10 = pnand %p1632_p6, %p455_p9 }
  0x13   : > { %2690 = sst [smem:[#allocation10_spill]] %s2689_s26  ;;  %p518_p11 = scmp.lt.s32.totalorder (!%p456_p10), %s2181_s18, 1  ;;  %v547_v0 = vld [vmem:[%s2667_s3] sm:$0xff] (!%p456_p10)  ;;  %vm693_vm0 = vcmask (!%p456_p10), 64512   ;;  %vm563_vm1 = vcmask (!%p456_p10), 261120   ;;  %v548_v2 = vld [vmem:[%s2667_s3 + $0x8] sm:$0xff] (!%p456_p10) }
  0x14   : > { %459 = sbr.rel (%p456_p10) target bundleno = 952 (0x3b8), region = 72  ;;  %v555_v1 = vld [vmem:[%s2668_s4] sm:$0xff] (!%p456_p10)  ;;  %1796 = vmatprep.mubr.msk.f32.mxu0 (!%p456_p10), %vm693_vm0, %v547_v0  ;;  %v549_v6 = vld [vmem:[%s2667_s3 + $0x10] sm:$0xff] (!%p456_p10)  ;;  %v824_v13 = vld [vmem:[%s2666_s2 + $0x8] sm:$0xff] (!%p456_p10)  ;;  %vm2193_vm2 = vmmov (!%p456_p10), 0   ;;  %s1682_s19 = sshll.u32 (!%p456_p10), %s2181_s18, 7 }
  0x15   : > { %1782 = vmatprep.mubr.msk.f32.mxu1 (!%p456_p10), %vm563_vm1, %v555_v1  ;;  %v1655_v10 = vld [vmem:[%s2666_s2 + $0x80] sm:$0xff] (!%p456_p10)  ;;  %v1656_v14 = vld [vmem:[%s2666_s2 + $0x88] sm:$0xff] (!%p456_p10)  ;;  %v1657_v16 = vld [vmem:[%s2666_s2 + $0x90] sm:$0xff] (!%p456_p10)  ;;  %s2617_s15 = scalar_lea.hbm (!%p456_p10), %s2677_s13, %s1682_s19 }
  0x16   : > { %v823_v12 = vld [vmem:[%s2666_s2] sm:$0xff] (!%p456_p10)  ;;  %v1942_v15 = vpack.c.bf16 (!%p456_p10), %v1656_v14, %v1655_v10  ;;  %v1658_v17 = vld [vmem:[%s2666_s2 + $0x98] sm:$0xff] (!%p456_p10)  ;;  %v556_v22 = vld [vmem:[%s2668_s4 + $0x8] sm:$0xff] (!%p456_p10) }
  0x17   : > { %v550_v18 = vld [vmem:[%s2667_s3 + $0x18] sm:$0xff] (!%p456_p10)  ;;  %v1974_v19 = vpack.c.bf16 (!%p456_p10), %v824_v13, %v823_v12  ;;  %v551_v20 = vld [vmem:[%s2667_s3 + $0x20] sm:$0xff] (!%p456_p10)  ;;  %v1946_v21 = vpack.c.bf16 (!%p456_p10), %v1658_v17, %v1657_v16  ;;  %v557_v23 = vld [vmem:[%s2668_s4 + $0x10] sm:$0xff] (!%p456_p10) }
  0x18   : > { %v552_v24 = vld [vmem:[%s2667_s3 + $0x28] sm:$0xff] (!%p456_p10)  ;;  %v553_v25 = vld [vmem:[%s2667_s3 + $0x30] sm:$0xff] (!%p456_p10)  ;;  %v826_v27 = vld [vmem:[%s2666_s2 + $0x18] sm:$0xff] (!%p456_p10) }
  0x19   : > { %v825_v26 = vld [vmem:[%s2666_s2 + $0x10] sm:$0xff] (!%p456_p10)  ;;  %v558_v28 = vld [vmem:[%s2668_s4 + $0x18] sm:$0xff] (!%p456_p10)  ;;  %v1659_v29 = vld [vmem:[%s2666_s2 + $0xa0] sm:$0xff] (!%p456_p10) }
  0x1a   : > { %v1660_v30 = vld [vmem:[%s2666_s2 + $0xa8] sm:$0xff] (!%p456_p10)  ;;  %v559_v31 = vld [vmem:[%s2668_s4 + $0x20] sm:$0xff] (!%p456_p10)  ;;  %v554_v32 = vld [vmem:[%s2667_s3 + $0x38] sm:$0xff] (!%p456_p10)  ;;  %v1978_v33 = vpack.c.bf16 (!%p456_p10), %v826_v27, %v825_v26 }
  0x1b   : > { %s2339_s21 = scalar_select %p518_p11, %s2181_s18, 1  ;;  %v1950_v34 = vpack.c.bf16 %v1660_v30, %v1659_v29  ;;  %v560_v35 = vld [vmem:[%s2668_s4 + $0x28] sm:$0xff]  ;;  %v561_v36 = vld [vmem:[%s2668_s4 + $0x30] sm:$0xff]  ;;  %v827_v37 = vld [vmem:[%s2666_s2 + $0x20] sm:$0xff] }
  0x1c   : > { %v828_v38 = vld [vmem:[%s2666_s2 + $0x28] sm:$0xff]  ;;  %v562_v39 = vld [vmem:[%s2668_s4 + $0x38] sm:$0xff]  ;;  %v1661_v40 = vld [vmem:[%s2666_s2 + $0xb0] sm:$0xff]  ;;  %s2195_s18 = smov [#allocation3]  }
  0x1d   : > { %s1685_s23 = sshll.u32 %s2339_s21, 5  ;;  %s1634_s25 = sshll.u32 %s2339_s21, 3  ;;  %v1662_v41 = vld [vmem:[%s2666_s2 + $0xb8] sm:$0xff]  ;;  %v1982_v42 = vpack.c.bf16 %v828_v38, %v827_v37  ;;  %v829_v44 = vld [vmem:[%s2666_s2 + $0x30] sm:$0xff]  ;;  %v1663_v46 = vld [vmem:[%s2666_s2 + $0xc0] sm:$0xff] }
  0x1e   : > { %s526_s28 = scalar_lea.vmem %s2665_s1, %s1685_s23  ;;  %s521_s30 = scalar_lea.vmem %s2664_s0, %s1634_s25  ;;  %v1954_v43 = vpack.c.bf16 %v1662_v41, %v1661_v40  ;;  %v830_v45 = vld [vmem:[%s2666_s2 + $0x38] sm:$0xff]  ;;  %v1664_v47 = vld [vmem:[%s2666_s2 + $0xc8] sm:$0xff]  ;;  %v831_v50 = vld [vmem:[%s2666_s2 + $0x40] sm:$0xff] }
  0x1f   : > { %v2352_v3 = vld [vmem:[%s526_s28] sm:$0xff]  ;;  %v2354_v4 = vld [vmem:[%s526_s28 + $0x8] sm:$0xff]  ;;  %v2356_v5 = vld [vmem:[%s526_s28 + $0x10] sm:$0xff]  ;;  %v1986_v48 = vpack.c.bf16 %v830_v45, %v829_v44  ;;  %v1958_v49 = vpack.c.bf16 %v1664_v47, %v1663_v46  ;;  %s1291_s25 = sld [smem:[#allocation2]] }
  0x20   : > { %v2363_v7 = vpack.c.bf16 %v2354_v4, %v2352_v3  ;;  %v2365_v8 = vld [vmem:[%s526_s28 + $0x18] sm:$0xff]  ;;  %v542_v9 = vld [vmem:[%s521_s30] sm:$0xff]  ;;  %v832_v51 = vld [vmem:[%s2666_s2 + $0x48] sm:$0xff]  ;;  %s1686_s30 = sshll.u32 %s2339_s21, 6 }
  0x21   : > { %v2372_v11 = vpack.c.bf16 %v2365_v8, %v2356_v5  ;;  %1794 = vmatprep.subr.mxu0 %v542_v9  ;;  %v1665_v52 = vld [vmem:[%s2666_s2 + $0xd0] sm:$0xff]  ;;  %v1666_v53 = vld [vmem:[%s2666_s2 + $0xd8] sm:$0xff]  ;;  %v1990_v54 = vpack.c.bf16 %v832_v51, %v831_v50  ;;  %v1667_v58 = vld [vmem:[%s2666_s2 + $0xe0] sm:$0xff]  ;;  %s2556_s17 = scalar_lea.vmem %s2678_s14, %s1686_s30  ;;  %s505_s30 = sand.u32 1, %s2173_s16  }
  0x22   : > { %1935 = vmatprep.subr.bf16.mxu1 %v2363_v7  ;;  %1795 = vmatpush3.msra.mxu0 %v542_v9  ;;  %v1962_v55 = vpack.c.bf16 %v1666_v53, %v1665_v52  ;;  %v833_v56 = vld [vmem:[%s2666_s2 + $0x50] sm:$0xff]  ;;  %v834_v57 = vld [vmem:[%s2666_s2 + $0x58] sm:$0xff]  ;;  %v1668_v59 = vld [vmem:[%s2666_s2 + $0xe8] sm:$0xff]  ;;  %1465 = vst [vmem:[%s2556_s17 + $0x20] sm:$0xff] %v2352_v3  ;;  %s1633_s12 = sshll.u32 %s505_s30, 3  ;;  %s1470_s26 = scalar_lea.sflag [#allocation4], %s505_s30 }
  0x23   : > { %1937 = vmatpush3.bf16.msra.mxu1 %v2363_v7  ;;  %1797 = vmatmul.mubr.msk.f32.vlgmr.msra.gmra.mrb[0].mxu0 %vm693_vm0, %v548_v2  ;;  %v1994_v60 = vpack.c.bf16 %v834_v57, %v833_v56  ;;  %v1966_v61 = vpack.c.bf16 %v1668_v59, %v1667_v58  ;;  %v835_v62 = vld [vmem:[%s2666_s2 + $0x60] sm:$0xff]  ;;  %v836_v63 = vld [vmem:[%s2666_s2 + $0x68] sm:$0xff]  ;;  %v837_v1 = vld [vmem:[%s2666_s2 + $0x70] sm:$0xff]  ;;  %1466 = vst [vmem:[%s2556_s17 + $0x28] sm:$0xff] %v2354_v4  ;;  %s507_s22 = scalar_lea.vmem [#allocation3], %s1633_s12 }
  0x24   : > { %1939 = vmatprep.subr.bf16.mxu1 %v2372_v11  ;;  %1799 = vmatprep.mubr.msk.f32.mxu0 %vm693_vm0, %v549_v6  ;;  %v1998_v0 = vpack.c.bf16 %v836_v63, %v835_v62  ;;  %v838_v2 = vld [vmem:[%s2666_s2 + $0x78] sm:$0xff]  ;;  %v1669_v9 = vld [vmem:[%s2666_s2 + $0xf0] sm:$0xff]  ;;  %v1026_v13 = vld [vmem:[%s2669_s5] sm:$0xff]  ;;  %1467 = vst [vmem:[%s2556_s17 + $0x30] sm:$0xff] %v2356_v5  ;;  %s1492_s27 = sshll.u32 %s507_s22, 4  ;;  %s2619_s27 = int_to_ptr.vmem [resolvable:$true] %s1492_s27 }
  0x25   : > { %1943 = vmatprep.subr.bf16.mxu0 %v1942_v15  ;;  %v2002_v6 = vpack.c.bf16 %v838_v2, %v837_v1  ;;  %v1670_v10 = vld [vmem:[%s2666_s2 + $0xf8] sm:$0xff]  ;;  %v1028_v14 = vld [vmem:[%s2669_s5 + $0x10] sm:$0xff]  ;;  %v1027_v16 = vld [vmem:[%s2669_s5 + $0x8] sm:$0xff]  ;;  %1468 = vst [vmem:[%s2556_s17 + $0x38] sm:$0xff] %v2365_v8  ;;  %s2111_s23 = scalar_lea.vmem %s2619_s27, 128 }
  0x26   : > { %v1970_v12 = vpack.c.bf16 %v1670_v10, %v1669_v9  ;;  %v1029_v17 = vld [vmem:[%s2669_s5 + $0x18] sm:$0xff]  ;;  %v1065_v47 = vld [vmem:[%s2671_s7] sm:$0xff]  ;;  %v1067_v3 = vld [vmem:[%s2671_s7 + $0x10] sm:$0xff]  ;;  %p2112_p12 = scmp.ne.s32.totalorder %s2619_s27, %s2111_s23 }
  0x27   : > { %1941 = vmatpush3.bf16.msra.mxu1 %v2372_v11  ;;  %1800 = vmatmul.mubr.msk.f32.gmra.mrb[2].mxu0 %vm693_vm0, %v550_v18  ;;  %v1263_v18 = vld [vmem:[%s2672_s8] sm:$0xff]  ;;  %v1068_v4 = vld [vmem:[%s2671_s7 + $0x18] sm:$0xff] }
  0x28   : > { %1802 = vmatprep.mubr.msk.f32.mxu0 %vm693_vm0, %v551_v20  ;;  %1975 = vmatprep.subr.bf16.mxu1 %v1974_v19  ;;  %v1265_v20 = vld [vmem:[%s2672_s8 + $0x10] sm:$0xff]  ;;  %p2113_p13 = pnand %p2112_p12, %p2314_p4 }
  0x29   : > { %1945 = vmatpush3.bf16.xpose.msra.mxu0 %v1942_v15  ;;  %v2191_v15 = vmov 0  }
  0x2a   : > { %1783 = vmatmul.mubr.msk.f32.vlgmr.msra.gmra.mrb[0].mxu1 %vm563_vm1, %v556_v22  ;;  %1947 = vmatprep.subr.bf16.mxu0 %v1946_v21  ;;  %v1453_v22 = vld [vmem:[%s2675_s11] sm:$0xff]  ;;  %p2114_p0 = pneg %p2113_p13 }
  0x2b   : > { %1785 = vmatprep.mubr.msk.f32.mxu1 %vm563_vm1, %v557_v23  ;;  %1803 = vmatmul.mubr.msk.f32.gmra.mrb[4].mxu0 %vm693_vm0, %v552_v24 }
  0x2c   : > { %1805 = vmatprep.mubr.msk.f32.mxu0 %vm693_vm0, %v553_v25  ;;  %2109 = vset.pattern.permute.xlu0 %v2191_v15 }
  0x2d   : > { %2110 = vset.pattern.permute.xlu1 %v2191_v15  ;;  %1032 = vperm.xlu0 %2109, %v1026_v13   ;;  %v1063_v13 = vld [vmem:[%s2670_s6 + $0x10] sm:$0xff] }
  0x2e   : > { %1786 = vmatmul.mubr.msk.f32.gmra.mrb[2].mxu1 %vm563_vm1, %v558_v28  ;;  %1042 = vperm.xlu1 %2110, %v1028_v14   ;;  %v1064_v14 = vld [vmem:[%s2670_s6 + $0x18] sm:$0xff] }
  0x2f   : > { %1788 = vmatprep.mubr.msk.f32.mxu1 %vm563_vm1, %v559_v31  ;;  %1806 = vmatmul.mubr.msk.f32.gmra.mrb[6].mxu0 %vm693_vm0, %v554_v32 }
  0x30   : > { %1977 = vmatpush3.bf16.xpose.msra.mxu1 %v1974_v19  ;;  %v1264_v19 = vld [vmem:[%s2672_s8 + $0x8] sm:$0xff] }
  0x31   : > { %1979 = vmatprep.subr.bf16.mxu1 %v1978_v33  ;;  %1949 = vmatpush3.bf16.xpose.msra.mxu0 %v1946_v21  ;;  %v1266_v21 = vld [vmem:[%s2672_s8 + $0x18] sm:$0xff] }
  0x32   : > { %1789 = vmatmul.mubr.msk.f32.gmra.mrb[4].mxu1 %vm563_vm1, %v560_v35  ;;  %1951 = vmatprep.subr.bf16.mxu0 %v1950_v34 }
  0x33   : > { %1791 = vmatprep.mubr.msk.f32.mxu1 %vm563_vm1, %v561_v36  ;;  %1037 = vperm.xlu0 %2109, %v1027_v16  }
  0x34   : > { %1047 = vperm.xlu1 %2110, %v1029_v17  }
  0x36   : > { %1792 = vmatmul.mubr.msk.f32.gmra.mrb[6].mxu1 %vm563_vm1, %v562_v39 }
  0x37   : > { %1269 = vperm.xlu0 %2109, %v1263_v18  }
  0x38   : > { %1981 = vmatpush3.bf16.xpose.msra.mxu1 %v1978_v33  ;;  %1274 = vperm.xlu1 %2110, %v1264_v19   ;;  %v2192_v19 = vmov 0.0|0.0  }
  0x39   : > { %1983 = vmatprep.subr.bf16.mxu1 %v1982_v42  ;;  %1953 = vmatpush3.bf16.xpose.msra.mxu0 %v1950_v34 }
  0x3a   : > { %1955 = vmatprep.subr.bf16.mxu0 %v1954_v43 }
  0x3b   : > { %1279 = vperm.xlu0 %2109, %v1265_v20   ;;  %v1306_v20 = vld [vmem:[%s2674_s10] sm:$0xff] }
  0x3c   : > { %1284 = vperm.xlu1 %2110, %v1266_v21   ;;  %v2194_v21 = vmov 0.0  }
  0x3f   : > { %1456 = vperm.xlu0 %2109, %v1453_v22  }
  0x40   : > { %1985 = vmatpush3.bf16.xpose.msra.mxu1 %v1982_v42 }
  0x41   : > { %1987 = vmatprep.subr.bf16.mxu1 %v1986_v48  ;;  %1957 = vmatpush3.bf16.xpose.msra.mxu0 %v1954_v43 }
  0x42   : > { %1959 = vmatprep.subr.bf16.mxu0 %v1958_v49 }
  0x48   : > { %1989 = vmatpush3.bf16.xpose.msra.mxu1 %v1986_v48  ;;  %v1066_v48 = vld [vmem:[%s2671_s7 + $0x8] sm:$0xff] }
  0x49   : > { %1991 = vmatprep.subr.bf16.mxu1 %v1990_v54  ;;  %1961 = vmatpush3.bf16.xpose.msra.mxu0 %v1958_v49  ;;  %v1061_v49 = vld [vmem:[%s2670_s6] sm:$0xff] }
  0x4a   : > { %1963 = vmatprep.subr.bf16.mxu0 %v1962_v55 }
  0x50   : > { %1993 = vmatpush3.bf16.xpose.msra.mxu1 %v1990_v54 }
  0x51   : > { %1995 = vmatprep.subr.bf16.mxu1 %v1994_v60  ;;  %1965 = vmatpush3.bf16.xpose.msra.mxu0 %v1962_v55 }
  0x52   : > { %1967 = vmatprep.subr.bf16.mxu0 %v1966_v61 }
  0x58   : > { %1997 = vmatpush3.bf16.xpose.msra.mxu1 %v1994_v60 }
  0x59   : > { %1999 = vmatprep.subr.bf16.mxu1 %v1998_v0  ;;  %1969 = vmatpush3.bf16.xpose.msra.mxu0 %v1966_v61 }
  0x5a   : > { %1971 = vmatprep.subr.bf16.mxu0 %v1970_v12 }
  0x60   : > { %2001 = vmatpush3.bf16.xpose.msra.mxu1 %v1998_v0 }
  0x61   : > { %2003 = vmatprep.subr.bf16.mxu1 %v2002_v6  ;;  %1973 = vmatpush3.bf16.xpose.msra.mxu0 %v1970_v12  ;;  %v1062_v12 = vld [vmem:[%s2670_s6 + $0x8] sm:$0xff] }
  0x68   : > { %2005 = vmatpush3.bf16.xpose.msra.mxu1 %v2002_v6 }
  0x69   : > { %2007 = vmatprep.subr.bf16.mxu1 %v2363_v7 }
  0xac   : > { %v1033_v50 = vpop.permute.xlu0 %1032 }
  0xad   : > { %v1043_v53 = vpop.permute.xlu1 %1042 }
  0xb2   : > { %v1038_v57 = vpop.permute.xlu0 %1037 }
  0xb3   : > { %v1048_v0 = vpop.permute.xlu1 %1047 }
  0xb7   : > { %v1275_v22 = vpop.permute.xlu1 %1274 }
  0xf6   : > { %v1798_v23 = vpop.f32.mrb[0].mxu0 }
  0xf7   : > { %v784_v24 = vpop.f32.mrb[1].mxu0 }
  0xfa   : > { %v1801_v25 = vpop.f32.mrb[2].mxu0 }
  0xfb   : > { %v794_v26 = vpop.f32.mrb[3].mxu0 }
  0xfd   : > { %v1784_v27 = vpop.f32.mrb[0].mxu1 }
  0xfe   : > { %v790_v28 = vadd.f32 %v1798_v23, %v1784_v27  ;;  %v654_v29 = vpop.f32.mrb[1].mxu1  ;;  %v1804_v30 = vpop.f32.mrb[4].mxu0 }
  0xff   : > { %v785_v31 = vadd.f32 %v784_v24, %v654_v29  ;;  %v804_v32 = vpop.f32.mrb[5].mxu0  ;;  %v1270_v24 = vpop.permute.xlu0 %1269 }
 0x101   : > { %v1787_v33 = vpop.f32.mrb[2].mxu1  ;;  %1878 = vmatprep.mubr.f32.mxu1 %v785_v31 }
 0x102   : > { %v800_v34 = vadd.f32 %v1801_v25, %v1787_v33  ;;  %v664_v35 = vpop.f32.mrb[3].mxu1  ;;  %1879 = vmatmul.mubr.f32.vlgmr.msra.gmra.mrb[8].mxu1 %v790_v28  ;;  %v1807_v36 = vpop.f32.mrb[6].mxu0 }
 0x103   : > { %v795_v37 = vadd.f32 %v794_v26, %v664_v35  ;;  %v814_v38 = vpop.f32.mrb[7].mxu0  ;;  %2009 = vmatpush3.bf16.msra.mxu1 %v2363_v7  ;;  %v1285_v33 = vpop.permute.xlu1 %1284 }
 0x104   : > { %2011 = vmatprep.subr.bf16.mxu1 %v2372_v11 }
 0x105   : > { %v1790_v39 = vpop.f32.mrb[4].mxu1  ;;  %1881 = vmatprep.mubr.f32.mxu1 %v795_v37 }
 0x106   : > { %v810_v40 = vadd.f32 %v1804_v30, %v1790_v39  ;;  %v674_v41 = vpop.f32.mrb[5].mxu1  ;;  %1882 = vmatmul.mubr.f32.gmra.mrb[10].mxu1 %v800_v34 }
 0x107   : > { %v805_v42 = vadd.f32 %v804_v32, %v674_v41  ;;  %2013 = vmatpush3.bf16.msra.mxu1 %v2372_v11  ;;  %1892 = vmatprep.mubr.msk.f32.mxu1 %vm563_vm1, %v1065_v47  ;;  %v1305_v47 = vld [vmem:[%s2673_s9] sm:$0xff] }
 0x108   : > { %2022 = vmatprep.subr.bf16.mxu1 %v2192_v19 }
 0x109   : > { %v1793_v43 = vpop.f32.mrb[6].mxu1  ;;  %1840 = vmatprep.mubr.f32.mxu0 %v805_v42 }
 0x10a   : > { %v820_v44 = vadd.f32 %v1807_v36, %v1793_v43  ;;  %v684_v45 = vpop.f32.mrb[7].mxu1  ;;  %1841 = vmatmul.mubr.f32.vlgmr.msra.gmra.mrb[8].mxu0 %v810_v40  ;;  %1893 = vmatmul.mubr.msk.f32.vlgmr.msra.gmra.mrb[12].mxu1 %vm563_vm1, %v1066_v48  ;;  %v1280_v36 = vpop.permute.xlu0 %1279 }
 0x10b   : > { %v815_v46 = vadd.f32 %v814_v38, %v684_v45  ;;  %1895 = vmatprep.mubr.msk.f32.mxu1 %vm563_vm1, %v1067_v3  ;;  %2024 = vmatpush3.bf16.msra.mxu1 %v2363_v7  ;;  %v1296_v7 = vstv %s1291_s25  ;;  %s2115_s25 = sshll.u32 %s2195_s18, 4  ;;  %s2116_s25 = int_to_ptr.vmem [resolvable:$false] %s2115_s25 }
 0x10c   : > { %2025 = vmatprep.subr.bf16.mxu1 %v2192_v19  ;;  %s2117_s28 = scalar_lea.vmem %s2116_s25, 256  ;;  %p2118_p1 = scmp.lt.s32.totalorder %s2619_s27, %s2116_s25 }
 0x10d   : > { %1843 = vmatprep.mubr.f32.mxu0 %v815_v46  ;;  %p2119_p2 = scmp.lt.s32.totalorder %s2117_s28, %s2111_s23 }
 0x10e   : > { %1844 = vmatmul.mubr.f32.gmra.mrb[10].mxu0 %v820_v44  ;;  %1896 = vmatmul.mubr.msk.f32.gmra.mrb[14].mxu1 %vm563_vm1, %v1068_v4 }
 0x10f   : > { %1906 = vmatprep.mubr.msk.f32.mxu0 %vm563_vm1, %v1061_v49  ;;  %2027 = vmatpush3.bf16.msra.mxu1 %v2372_v11  ;;  %p2120_p3 = por %p2119_p2, %p2118_p1 }
 0x110   : > { %1920 = vmatprep.mubr.msk.f32.mxu1 %vm2193_vm2, %v2194_v21 }
 0x111   : > { %p2121_p5 = pnand %p2120_p3, %p2114_p0 }
 0x112   : > { %1921 = vmatmul.mubr.msk.f32.vlgmr.msra.gmra.mrb[16].mxu1 %vm563_vm1, %v1306_v20 }
 0x1d5   : > { %v1880_v5 = vpop.f32.mrb[8].mxu1 }
 0x1d6   : > { %v1007_v8 = vpop.f32.mrb[9].mxu1 }
 0x1d9   : > { %v1883_v51 = vpop.f32.mrb[10].mxu1 }
 0x1da   : > { %v1017_v52 = vpop.f32.mrb[11].mxu1 }
 0x1dd   : > { %v1842_v54 = vpop.f32.mrb[8].mxu0  ;;  %v1894_v15 = vpop.f32.mrb[12].mxu1 }
 0x1de   : > { %v1013_v55 = vadd.f32 %v1880_v5, %v1842_v54  ;;  %v922_v56 = vpop.f32.mrb[9].mxu0  ;;  %v1147_v16 = vpop.f32.mrb[13].mxu1 }
 0x1df   : > { %v1008_v58 = vadd.f32 %v1007_v8, %v922_v56  ;;  %v1457_v8 = vpop.permute.xlu0 %1456 }
 0x1e0   : > { %v1051_v59 = vadd.f32 %v1038_v57, %v1013_v55 }
 0x1e1   : > { %v1050_v60 = vadd.f32 %v1033_v50, %v1008_v58  ;;  %v1845_v61 = vpop.f32.mrb[10].mxu0  ;;  %v1897_v17 = vpop.f32.mrb[14].mxu1 }
 0x1e2   : > { %v1023_v62 = vadd.f32 %v1883_v51, %v1845_v61  ;;  %v932_v63 = vpop.f32.mrb[11].mxu0  ;;  %v1157_v18 = vpop.f32.mrb[15].mxu1 }
 0x1e3   : > { %v1018_v1 = vadd.f32 %v1017_v52, %v932_v63  ;;  %v2014_v2 = vpack.c.bf16 %v1051_v59, %v1050_v60 }
 0x1e4   : > { %v1053_v6 = vadd.f32 %v1048_v0, %v1023_v62 }
 0x1e5   : > { %v1052_v9 = vadd.f32 %v1043_v53, %v1018_v1  ;;  %2015 = vmatprep.subr.bf16.mxu0 %v2014_v2  ;;  %v1376_v48 = vpop.f32.mrb[16].mxu1 }
 0x1e6   : > { %2017 = vmatpush3.bf16.msra.mxu0 %v2014_v2  ;;  %v1922_v49 = vpop.f32.mrb[17].mxu1 }
 0x1e7   : > { %v2018_v10 = vpack.c.bf16 %v1053_v6, %v1052_v9 }
 0x1e9   : > { %2019 = vmatprep.subr.bf16.mxu0 %v2018_v10 }
 0x1ea   : > { %2021 = vmatpush3.bf16.msra.mxu0 %v2018_v10 }
 0x1eb   : > { %2028 = vmatprep.subr.bf16.mxu0 %v2192_v19 }
 0x1ed   : > { %1907 = vmatmul.mubr.msk.f32.vlgmr.msra.gmra.mrb[12].mxu0 %vm563_vm1, %v1062_v12 }
 0x1ee   : > { %1909 = vmatprep.mubr.msk.f32.mxu0 %vm563_vm1, %v1063_v13 }
 0x1f1   : > { %1910 = vmatmul.mubr.msk.f32.gmra.mrb[14].mxu0 %vm563_vm1, %v1064_v14 }
 0x1f2   : > { %1931 = vmatprep.mubr.msk.f32.mxu0 %vm2193_vm2, %v2194_v21 }
 0x2c0   : > { %v1908_v23 = vpop.f32.mrb[12].mxu0 }
 0x2c1   : > { %v1250_v25 = vadd.f32 %v1908_v23, %v1894_v15  ;;  %v1244_v26 = vpop.f32.mrb[13].mxu0 }
 0x2c2   : > { %v1245_v27 = vadd.f32 %v1244_v26, %v1147_v16 }
 0x2c3   : > { %v1288_v11 = vadd.f32 %v1275_v22, %v1250_v25 }
 0x2c4   : > { %v1287_v28 = vadd.f32 %v1270_v24, %v1245_v27  ;;  %v1911_v29 = vpop.f32.mrb[14].mxu0 }
 0x2c5   : > { %vm1293_vm3 = vcmp.ge.f32.partialorder %v1288_v11, 0.0  ;;  %v1298_v30 = vmul.f32 %v1296_v7, %v1288_v11  ;;  %v1260_v31 = vadd.f32 %v1911_v29, %v1897_v17  ;;  %v1254_v32 = vpop.f32.mrb[15].mxu0 }
 0x2c6   : > { %vm1292_vm4 = vcmp.ge.f32.partialorder %v1287_v28, 0.0  ;;  %v1297_v34 = vmul.f32 %v1296_v7, %v1287_v28  ;;  %v1255_v35 = vadd.f32 %v1254_v32, %v1157_v18 }
 0x2c7   : > { %v1302_v37 = vsel %vm1293_vm3, %v1288_v11, %v1298_v30  ;;  %v1290_v38 = vadd.f32 %v1285_v33, %v1260_v31 }
 0x2c8   : > { %1462 = vst [vmem:[%s2556_s17 + $0x8] sm:$0xff] %v1302_v37  ;;  %v1301_v39 = vsel %vm1292_vm4, %v1287_v28, %v1297_v34  ;;  %v1289_v40 = vadd.f32 %v1280_v36, %v1255_v35 }
 0x2c9   : > { %1461 = vst [vmem:[%s2556_s17] sm:$0xff] %v1301_v39  ;;  %vm1295_vm5 = vcmp.ge.f32.partialorder %v1290_v38, 0.0  ;;  %v1300_v41 = vmul.f32 %v1296_v7, %v1290_v38  ;;  %v2029_v42 = vpack.c.bf16 %v1302_v37, %v1301_v39 }
 0x2ca   : > { %vm1294_vm6 = vcmp.ge.f32.partialorder %v1289_v40, 0.0  ;;  %v1299_v43 = vmul.f32 %v1296_v7, %v1289_v40 }
 0x2cb   : > { %v1304_v44 = vsel %vm1295_vm5, %v1290_v38, %v1300_v41  ;;  %2030 = vmatpush3.bf16.msra.mxu0 %v2029_v42 }
 0x2cc   : > { %1464 = vst [vmem:[%s2556_s17 + $0x18] sm:$0xff] %v1304_v44  ;;  %v1303_v45 = vsel %vm1294_vm6, %v1289_v40, %v1299_v43  ;;  %2031 = vmatprep.subr.bf16.mxu0 %v2192_v19 }
 0x2cd   : > { %1463 = vst [vmem:[%s2556_s17 + $0x10] sm:$0xff] %v1303_v45  ;;  %v2032_v46 = vpack.c.bf16 %v1304_v44, %v1303_v45 }
 0x2cf   : > { %2033 = vmatpush3.bf16.msra.mxu0 %v2032_v46 }
 0x2d2   : > { %1932 = vmatmul.mubr.msk.f32.vlgmr.msra.gmra.mrb[16].mxu0 %vm563_vm1, %v1305_v47 }
 0x3a5   : > { %v1449_v3 = vpop.f32.mrb[16].mxu0 }
 0x3a6   : > { %v1450_v4 = vadd.f32 %v1449_v3, %v1376_v48  ;;  %v1933_v5 = vpop.f32.mrb[17].mxu0 }
 0x3a8   : > { %v1459_v50 = vadd.f32 %v1457_v8, %v1450_v4 }
 0x3aa   : > { %1460 = vst [vmem:[%s507_s22] sm:$0xff] %v1459_v50 }
 0x3ab   : > { %2124 = shalt.err (!%p2121_p5)
}
 0x3ac   : > { %s2125_s29 = scalar_lea.hbm %s2617_s15, 128  ;;  %s2129_s19 = scalar_lea.hbm %s2677_s13, 256 }
 0x3ad   : > { %p2126_p6 = scmp.ne.s32.totalorder %s2617_s15, %s2125_s29  ;;  %p2130_p10 = scmp.lt.u32.totalorder %s2617_s15, %s2677_s13 }
 0x3ae   : > { %p2131_p11 = scmp.lt.u32.totalorder %s2129_s19, %s2125_s29  ;;  %p2133_p13 = scmp.lt.u32.totalorder %s2125_s29, %s2617_s15 }
 0x3af   : > { %p2127_p7 = pnand %p2126_p6, %p2314_p4 }
 0x3b0   : > { %p2132_p12 = por %p2131_p11, %p2130_p10 }
 0x3b1   : > { %p2128_p9 = pneg %p2127_p7 }
 0x3b2   : > { %p2134_p0 = por %p2133_p13, %p2132_p12 }
 0x3b4   : > { %p2135_p1 = pnand %p2134_p0, %p2128_p9 }
 0x3b6   : > { %2138 = shalt.err (!%p2135_p1)
}
 0x3b7   : > { %2050 = dma.vmem_to_hbm [thread:$0]  (%p2314_p4), %s2619_s27, 128, %s2617_s15, %s1470_s26  }
 0x3b8 PF: > { %s2692_s21 = sld [smem:[#allocation6_spill]]  ;;  %p2056_p2 = scmp.ge.s32.totalorder %s2189_s20, 2 }
 0x3ba   : > { %p2053_p3 = pnand %p2056_p2, %p2321_p8 }
 0x3be   : > { %s1507_s18 = sand.u32 1, %s2692_s21  }
 0x3bf   : > { %s1508_s25 = scalar_lea.sflag [#allocation4], %s1507_s18 }
 0x3c0   : > { %2164 = dma.done.wait (!%p2053_p3), %s1508_s25, 128  }
 0x3c1   : > { %2166 = vsyncadd (!%p2053_p3), %s1508_s25, 4294967168  ;;  %s29_s20 = sadd.s32 1, %s2189_s20   ;;  %s2694_s28 = sld [smem:[#allocation7_spill]] }
 0x3c2   : > { %p26_p5 = scmp.ge.s32.totalorder %s29_s20, 4   ;;  %s2695_s17 = sld [smem:[#allocation11_spill]] }
 0x3c3   : > { %s2696_s18 = sld [smem:[#allocation8_spill]]  ;;  %s2697_s19 = sld [smem:[#allocation9_spill]] }
 0x3c4   : > { %s2698_s15 = smov %s2173_s16  ;;  %28 = sbr.rel (!%p26_p5) target bundleno = 6 (0x6), region = 127 }
 0x3c7   : > { %s2699_s16 = smov %s2694_s28 }
 0x3cb   :  { %1524 = vsyncpa [#allocation4], 1 }
 0x3cc   :  { %1526 = vsyncpa [#allocation4 + $0x1], 1 }

</bundles_post_ra>
